<compile_context>
chip_gen: v5e
topology: v5e:2x2
jax: 0.10.0
libtpu: 0.0.40
codegen_flags: <defaults>
</compile_context>

<pallas_src>
import jax
import jax.numpy as jnp
from jax import lax
from jax.experimental import pallas as pl
from jax.experimental.pallas import tpu as pltpu

EPS = 1e-5  # nn.InstanceNorm1d default

_VMEM_BLOCK_BUDGET_BYTES = 20 * 1024 * 1024   # budget for double-buffered blocks
_VMEM_LIMIT_BYTES = 32 * 1024 * 1024          # scoped VMEM limit (safe on v5e/v6e/v7x)


def _add_instance_norm_kernel(x1_ref, x2_ref, gb_ref, o_ref):
    # x1_ref / x2_ref / o_ref: (Bblk, S, E) block; gb_ref: (2, E) = [gamma; beta].
    # Upcast before the add (avoids low-precision accumulation for bf16 inputs).
    x = x1_ref[...].astype(jnp.float32) + x2_ref[...].astype(jnp.float32)

    # InstanceNorm1d: mean / biased variance over the spatial dim S (axis=1,
    # the sublane axis of the (S, E) minor tile).
    mean = jnp.mean(x, axis=1, keepdims=True)                     # (Bblk, 1, E)
    centered = x - mean
    var = jnp.mean(centered * centered, axis=1, keepdims=True)    # (Bblk, 1, E)
    inv_std = lax.rsqrt(var + EPS)                                # EUP

    gamma = gb_ref[0:1, :].astype(jnp.float32)[:, None, :]        # (1, 1, E)
    beta = gb_ref[1:2, :].astype(jnp.float32)[:, None, :]         # (1, 1, E)

    # Fold affine into one full-tile mul + one full-tile add.
    scale = inv_std * gamma                                       # (Bblk, 1, E)
    o_ref[...] = (centered * scale + beta).astype(o_ref.dtype)


def _pick_batch_block(B, S, E):
    """Largest Bblk dividing B that keeps double-buffered blocks in budget;
    prefer >= 2 grid steps so both v7x TensorCores get work."""
    bytes_per_b = S * E * 4  # f32 compute copies
    # 3 arrays (2 in + 1 out) x 2 pipeline buffers per block.
    cap = max(1, _VMEM_BLOCK_BUDGET_BYTES // (6 * bytes_per_b))
    b_blk = min(B, cap)
    while B % b_blk != 0:
        b_blk -= 1
    # Keep at least 2 grid steps when possible (megacore + pipelining).
    if b_blk == B and B > 1:
        cand = B // 2
        while B % cand != 0:
            cand -= 1
        b_blk = max(1, cand)
    return b_blk


def add_and_instance_norm(x1, x2, gamma, beta):
    """x1, x2: (B, S, E); gamma, beta: (E,). Returns (B, S, E)."""
    B, S, E = x1.shape
    gb = jnp.stack([gamma, beta], axis=0)  # (2, E)

    b_blk = _pick_batch_block(B, S, E)
    grid = (B // b_blk,)

    return pl.pallas_call(
        _add_instance_norm_kernel,
        out_shape=jax.ShapeDtypeStruct((B, S, E), x1.dtype),
        grid_spec=pltpu.PrefetchScalarGridSpec(
            num_scalar_prefetch=0,
            grid=grid,
            in_specs=[
                pl.BlockSpec((b_blk, S, E), lambda b: (b, 0, 0)),
                pl.BlockSpec((b_blk, S, E), lambda b: (b, 0, 0)),
                pl.BlockSpec((2, E), lambda b: (0, 0)),
            ],
            out_specs=pl.BlockSpec((b_blk, S, E), lambda b: (b, 0, 0)),
        ),
        compiler_params=pltpu.CompilerParams(
            dimension_semantics=("parallel",),
            vmem_limit_bytes=_VMEM_LIMIT_BYTES,
        ),
    )(x1, x2, gb)


def _reference(x1, x2, gamma, beta):
    added = x1.astype(jnp.float32) + x2.astype(jnp.float32)
    mean = jnp.mean(added, axis=1, keepdims=True)
    var = jnp.mean((added - mean) ** 2, axis=1, keepdims=True)
    normed = (added - mean) / jnp.sqrt(var + EPS)
    return normed * gamma[None, None, :] + beta[None, None, :]


if __name__ == "__main__":
    B, S, E = 2, 8, 32  # batch, problem size (seq), embedding_dim

    key = jax.random.PRNGKey(0)
    k1, k2, k3, k4 = jax.random.split(key, 4)
    x1 = jax.random.normal(k1, (B, S, E), dtype=jnp.float32)
    x2 = jax.random.normal(k2, (B, S, E), dtype=jnp.float32)
    # Non-trivial deterministic affine params (PyTorch init would be ones/zeros).
    gamma = 1.0 + 0.1 * jax.random.normal(k3, (E,), dtype=jnp.float32)
    beta = 0.1 * jax.random.normal(k4, (E,), dtype=jnp.float32)

    out = add_and_instance_norm(x1, x2, gamma, beta)
    out = jax.block_until_ready(out)

    ref = _reference(x1, x2, gamma, beta)
    assert out.shape == (B, S, E)
    assert jnp.allclose(out, ref, atol=1e-4, rtol=1e-4), "mismatch vs reference"

    print("KERNEL_OK")
</pallas_src>

<mosaic_0001>
module attributes {stable_mosaic.version = 11 : i64} {
  func.func @_add_instance_norm_kernel(%arg0: i32, %arg1: memref<1x8x32xf32, #tpu.memory_space<vmem>>, %arg2: memref<1x8x32xf32, #tpu.memory_space<vmem>>, %arg3: memref<2x32xf32, #tpu.memory_space<vmem>>, %arg4: memref<1x8x32xf32, #tpu.memory_space<vmem>>) attributes {dimension_semantics = [#tpu.dimension_semantics<parallel>], iteration_bounds = array<i64: 2>, scalar_prefetch = 0 : i64, scratch_operands = 0 : i64, tpu.core_type = #tpu.core_type<tc>, window_params = [{transform_indices = @transform_0, window_bounds = array<i64: 1, 8, 32>}, {transform_indices = @transform_1, window_bounds = array<i64: 1, 8, 32>}, {pipeline_mode = #tpu.pipeline_mode<synchronous>, transform_indices = @transform_2, window_bounds = array<i64: 2, 32>}, {transform_indices = @transform_3, window_bounds = array<i64: 1, 8, 32>}]} {
    %c0 = arith.constant 0 : index
    %c0_0 = arith.constant 0 : index
    %c0_1 = arith.constant 0 : index
    %0 = vector.load %arg1[%c0, %c0_0, %c0_1] : memref<1x8x32xf32, #tpu.memory_space<vmem>>, vector<1x8x32xf32>
    %c0_2 = arith.constant 0 : index
    %c0_3 = arith.constant 0 : index
    %c0_4 = arith.constant 0 : index
    %1 = vector.load %arg2[%c0_2, %c0_3, %c0_4] : memref<1x8x32xf32, #tpu.memory_space<vmem>>, vector<1x8x32xf32>
    %2 = arith.addf %0, %1 : vector<1x8x32xf32>
    %cst = arith.constant dense<0.000000e+00> : vector<1x32xf32>
    %3 = vector.multi_reduction <add>, %2, %cst [1] : vector<1x8x32xf32> to vector<1x32xf32>
    %4 = vector.shape_cast %3 : vector<1x32xf32> to vector<1x1x32xf32>
    %cst_5 = arith.constant 8.000000e+00 : f32
    %5 = vector.broadcast %cst_5 : f32 to vector<1x1x32xf32>
    %6 = arith.divf %4, %5 : vector<1x1x32xf32>
    %7 = vector.broadcast %6 : vector<1x1x32xf32> to vector<1x8x32xf32>
    %8 = arith.subf %2, %7 : vector<1x8x32xf32>
    %9 = arith.mulf %8, %8 : vector<1x8x32xf32>
    %cst_6 = arith.constant dense<0.000000e+00> : vector<1x32xf32>
    %10 = vector.multi_reduction <add>, %9, %cst_6 [1] : vector<1x8x32xf32> to vector<1x32xf32>
    %11 = vector.shape_cast %10 : vector<1x32xf32> to vector<1x1x32xf32>
    %cst_7 = arith.constant 8.000000e+00 : f32
    %12 = vector.broadcast %cst_7 : f32 to vector<1x1x32xf32>
    %13 = arith.divf %11, %12 : vector<1x1x32xf32>
    %cst_8 = arith.constant 9.99999974E-6 : f32
    %14 = vector.broadcast %cst_8 : f32 to vector<1x1x32xf32>
    %15 = arith.addf %13, %14 : vector<1x1x32xf32>
    %16 = math.rsqrt %15 : vector<1x1x32xf32>
    %c0_9 = arith.constant 0 : index
    %c0_10 = arith.constant 0 : index
    %17 = vector.load %arg3[%c0_9, %c0_10] : memref<2x32xf32, #tpu.memory_space<vmem>>, vector<1x32xf32>
    %18 = vector.shape_cast %17 : vector<1x32xf32> to vector<1x1x32xf32>
    %c1 = arith.constant 1 : index
    %c0_11 = arith.constant 0 : index
    %19 = vector.load %arg3[%c1, %c0_11] : memref<2x32xf32, #tpu.memory_space<vmem>>, vector<1x32xf32>
    %20 = vector.shape_cast %19 : vector<1x32xf32> to vector<1x1x32xf32>
    %21 = arith.mulf %16, %18 : vector<1x1x32xf32>
    %22 = vector.broadcast %21 : vector<1x1x32xf32> to vector<1x8x32xf32>
    %23 = arith.mulf %8, %22 : vector<1x8x32xf32>
    %24 = vector.broadcast %20 : vector<1x1x32xf32> to vector<1x8x32xf32>
    %25 = arith.addf %23, %24 : vector<1x8x32xf32>
    %c0_12 = arith.constant 0 : index
    %c0_13 = arith.constant 0 : index
    %c0_14 = arith.constant 0 : index
    %26 = vector.load %arg4[%c0_12, %c0_13, %c0_14] : memref<1x8x32xf32, #tpu.memory_space<vmem>>, vector<1x8x32xf32>
    tpu.vector_store %arg4[%c0_12, %c0_13, %c0_14], %25 {strides = array<i32>} : memref<1x8x32xf32, #tpu.memory_space<vmem>>, vector<1x8x32xf32>,
    return
  }
  func.func @transform_0(%arg0: i32) -> (i32, i32, i32) {
    %c0_i32 = arith.constant 0 : i32
    %c0_i32_0 = arith.constant 0 : i32
    %c0_i32_1 = arith.constant 0 : i32
    return %arg0, %c0_i32, %c0_i32_0 : i32, i32, i32
  }
  func.func @transform_1(%arg0: i32) -> (i32, i32, i32) {
    %c0_i32 = arith.constant 0 : i32
    %c0_i32_0 = arith.constant 0 : i32
    %c0_i32_1 = arith.constant 0 : i32
    return %arg0, %c0_i32, %c0_i32_0 : i32, i32, i32
  }
  func.func @transform_2(%arg0: i32) -> (i32, i32) {
    %c0_i32 = arith.constant 0 : i32
    %c0_i32_0 = arith.constant 0 : i32
    %c0_i32_1 = arith.constant 0 : i32
    return %c0_i32, %c0_i32_0 : i32, i32
  }
  func.func @transform_3(%arg0: i32) -> (i32, i32, i32) {
    %c0_i32 = arith.constant 0 : i32
    %c0_i32_0 = arith.constant 0 : i32
    %c0_i32_1 = arith.constant 0 : i32
    return %arg0, %c0_i32, %c0_i32_0 : i32, i32, i32
  }
}

</mosaic_0001>

<bundles_post_ra>
// kernel: tpu_custom_call.1
= control target key start
LH: loop header
LB: loop body
LE: loop exit
PB: predicated region body
PF: predicated region fallthrough
CT: control target
= control target key end

     0   :  { %s851_s0 = inlined_call_operand.hbm [shape: f32[2,8,32], index: 0, kind: input, shape index: {}]   ;;  %s852_s1 = inlined_call_operand.hbm [shape: f32[2,8,32], index: 1, kind: input, shape index: {}]   ;;  %s853_s2 = inlined_call_operand.hbm [shape: f32[2,32], index: 2, kind: input, shape index: {}]   ;;  %s854_s3 = inlined_call_operand.hbm [shape: f32[2,8,32], index: 3, kind: output, shape index: {}]  }
   0x1   :  { %855 = sst [smem:[#allocation14_spill]] %s853_s2 }
   0x2   :  { %8 = vsyncpa [#allocation3], 0 }
   0x3   :  { %10 = vsyncpa [#allocation3 + $0x1], 0 }
   0x4   :  { %11 = vsyncpa [#allocation6], 0 }
   0x5   :  { %13 = vsyncpa [#allocation6 + $0x1], 0 }
   0x6   :  { %14 = vsyncpa [#allocation4], 0 }
   0x7   :  { %16 = vsyncpa [#allocation4 + $0x1], 0  ;;  %s680_s12 = smov 0   ;;  %s682_s13 = smov 0  }
   0x8   :  { %s684_s14 = smov 0   ;;  %s686_s15 = smov 0  }
   0x9 LB: > { %s701_s16 = sadd.s32 4294967295, %s656_s15   ;;  %s407_s17 = sadd.s32 4294967294, %s656_s15   ;;  %s656_s15 = sphi %s686_s15, %s868_s15   ;;  %s652_s14 = sphi %s684_s14, %s867_s14   ;;  %s648_s13 = sphi %s682_s13, %s866_s13   ;;  %s644_s12 = sphi %s680_s12, %s865_s12  }
   0xa   : > { %p42_p0 = scmp.ne.s32.totalorder %s648_s13, %s644_s12  ;;  %p43_p1 = scmp.eq.s32.totalorder %s701_s16, 0 }
   0xb   : > { %p113_p2 = scmp.eq.s32.totalorder %s701_s16, 1  ;;  %p119_p3 = scmp.eq.s32.totalorder %s407_s17, 1 }
   0xc   : > { %p710_p4 = por %p43_p1, %p42_p0  ;;  %p408_p5 = scmp.ge.s32.totalorder %s656_s15, 1 }
   0xd   : > { %p715_p6 = por %p119_p3, %p42_p0  ;;  %p126_p7 = scmp.lt.s32.totalorder %s656_s15, 3 }
   0xe   : > { %s858_s2 = sld [smem:[#allocation14_spill]]  ;;  %s658_s24 = smov [#allocation7]  }
   0xf   : > { %p723_p8 = pnand %p408_p5, %p126_p7  ;;  %s140_s25 = sshll.u32 %s658_s24, 4  ;;  %s141_s25 = int_to_ptr.vmem [resolvable:$true] %s140_s25 }
  0x10   : > { %s733_s26 = sadd.s32 1, %s656_s15   ;;  %s29_s27 = sadd.s32 1, %s652_s14 }
  0x11   : > { %p434_p10 = pneg %p723_p8  ;;  %s26_s28 = ssub.s32 %s656_s15, %s733_s26 }
  0x12   : > { %p27_p12 = scmp.eq.s32.totalorder %s26_s28, 0  ;;  %p36_p13 = scmp.ne.s32.totalorder %s652_s14, %s648_s13 }
  0x13   : > { %p435_p11 = pnand %p434_p10, %p43_p1  ;;  %p37_p0 = scmp.eq.s32.totalorder %s656_s15, 0 }
  0x14   : > { %s138_s22 = sshll.u32 %s858_s2, 4  ;;  %p450_p3 = scmp.lt.s32.totalorder %s656_s15, 2  ;;  %s139_s22 = int_to_ptr.hbm [resolvable:$true] %s138_s22 }
  0x15   : > { %437 = dma.hbm_to_vmem [thread:$0]  (!%p435_p11), %s139_s22, 32, %s141_s25, [#allocation6]  }
  0x16   : > { %s743_s29 = scalar_select %p27_p12, %s652_s14, %s29_s27  }
  0x17   : > { %p38_p5 = por %p37_p0, %p36_p13  ;;  %p747_p7 = por %p113_p2, %p36_p13 }
  0x18   : > { %860 = sst [smem:[#allocation13_spill]] %s743_s29  ;;  %s151_s4 = sand.u32 1, %s652_s14  }
  0x19   : > { %s412_s5 = sshll.u32 %s656_s15, 3  ;;  %s411_s6 = sshll.u32 %s151_s4, 3 }
  0x1a   : > { %s159_s9 = scalar_lea.hbm %s851_s0, %s412_s5  ;;  %s155_s11 = scalar_lea.vmem [#allocation2], %s411_s6 }
  0x1b   : > { %s161_s10 = sshll.u32 %s159_s9, 4  ;;  %s163_s17 = sshll.u32 %s155_s11, 4  ;;  %s162_s10 = int_to_ptr.hbm [resolvable:$true] %s161_s10  ;;  %s164_s17 = int_to_ptr.vmem [resolvable:$true] %s163_s17 }
  0x1c   : > { %p758_p10 = pnand %p450_p3, %p38_p5  ;;  %s178_s24 = scalar_lea.hbm %s852_s1, %s412_s5 }
  0x1d   : > { %s170_s25 = sand.u32 1, %s656_s15   ;;  %s152_s27 = scalar_lea.sflag [#allocation3], %s151_s4 }
  0x1e   : > { %s522_s28 = sshra.s32 %s162_s10, 4  ;;  %p526_p11 = pneg %p758_p10  ;;  %s523_s28 = int_to_ptr.hbm [resolvable:$true] %s522_s28 }
  0x1f   : > { %s524_s7 = scalar_lea.hbm %s523_s28, 8  ;;  %s529_s11 = scalar_lea.hbm %s851_s0, 16 }
  0x20   : > { %p525_p2 = scmp.ne.s32.totalorder %s523_s28, %s524_s7  ;;  %p530_p0 = scmp.lt.s32.totalorder %s523_s28, %s851_s0 }
  0x21   : > { %p531_p3 = scmp.lt.s32.totalorder %s529_s11, %s524_s7 }
  0x22   : > { %p527_p12 = pnand %p526_p11, %p525_p2 }
  0x23   : > { %p532_p5 = por %p531_p3, %p530_p0 }
  0x24   : > { %p528_p13 = pneg %p527_p12 }
  0x26   : > { %p533_p9 = pnand %p532_p5, %p528_p13 }
  0x28   : > { %536 = shalt.err (!%p533_p9)
}
  0x29   : > { %441 = dma.hbm_to_vmem [thread:$0]  (!%p758_p10), %s162_s10, 128, %s164_s17, %s152_s27  }
  0x2a   : > { %s180_s4 = sshll.u32 %s178_s24, 4  ;;  %s174_s5 = scalar_lea.vmem [#allocation5], %s411_s6  ;;  %s181_s4 = int_to_ptr.hbm [resolvable:$true] %s180_s4 }
  0x2b   : > { %s182_s2 = sshll.u32 %s174_s5, 4  ;;  %s171_s29 = scalar_lea.sflag [#allocation6], %s170_s25  ;;  %s183_s2 = int_to_ptr.vmem [resolvable:$true] %s182_s2 }
  0x2c   : > { %s552_s8 = sshra.s32 %s181_s4, 4  ;;  %s559_s11 = scalar_lea.hbm %s852_s1, 16  ;;  %s553_s8 = int_to_ptr.hbm [resolvable:$true] %s552_s8 }
  0x2d   : > { %s554_s9 = scalar_lea.hbm %s553_s8, 8  ;;  %p560_p9 = scmp.lt.s32.totalorder %s553_s8, %s852_s1 }
  0x2e   : > { %p555_p2 = scmp.ne.s32.totalorder %s553_s8, %s554_s9  ;;  %p561_p13 = scmp.lt.s32.totalorder %s559_s11, %s554_s9 }
  0x30   : > { %p557_p12 = pnand %p555_p2, %p526_p11  ;;  %p562_p3 = por %p561_p13, %p560_p9 }
  0x32   : > { %p558_p0 = pneg %p557_p12 }
  0x34   : > { %p563_p5 = pnand %p562_p3, %p558_p0 }
  0x36   : > { %566 = shalt.err (!%p563_p5)
}
  0x37   : > { %444 = dma.hbm_to_vmem [thread:$0]  (!%p758_p10), %s181_s4, 128, %s183_s2, %s171_s29  }
  0x38   : > { %191 = sbr.rel (%p723_p8) target bundleno = 136 (0x88), region = 32  ;;  %s793_s6 = sand.u32 (!%p723_p8), 1, %s648_s13  }
  0x39   : > { %s796_s17 = sshll.u32 (!%p723_p8), %s793_s6, 3  ;;  %s194_s24 = scalar_lea.sflag (!%p723_p8), [#allocation3], %s793_s6 }
  0x3a   : > { %s197_s25 = scalar_lea.vmem (!%p723_p8), [#allocation2], %s796_s17 }
  0x3d   : > { %627 = dma.done.wait (%p710_p4), %s194_s24, 128  }
  0x3e   : > { %629 = vsyncadd (%p710_p4), %s194_s24, 4294967168  ;;  %s203_s2 = sand.u32 1, %s701_s16   ;;  %s207_s29 = scalar_lea.vmem [#allocation5], %s796_s17 }
  0x3f   : > { %s204_s23 = scalar_lea.sflag [#allocation6], %s203_s2 }
  0x40   : > { %631 = dma.done.wait (%p710_p4), %s204_s23, 128  }
  0x41   : > { %633 = vsyncadd (%p710_p4), %s204_s23, 4294967168 }
  0x42   : > { %635 = dma.done.wait (%p43_p1), [#allocation6], 32  }
  0x43   : > { %637 = vsyncadd (%p43_p1), [#allocation6], 4294967264  ;;  %v659_v0 = vmov 8.0   ;;  %v241_v2 = vld [vmem:[%s197_s25] sm:$0xff]  ;;  %v242_v3 = vld [vmem:[%s207_s29] sm:$0xff]  ;;  %vm244_vm0 = vcmask 261120  }
  0x44   : > { %488 = vrcp.f32 %v659_v0  ;;  %v243_v4 = vadd.f32 %v242_v3, %v241_v2  ;;  %v281_v35 = vld [vmem:[#allocation7] sm:$0x1]  ;;  %s421_s18 = sshll.u32 %s701_s16, 3  ;;  %v487_v39 = vld [vmem:[#allocation7 + $0x1] ss:$0 sm:$0xff]  ;;  %s240_s4 = scalar_lea.vmem [#allocation8], %s796_s17 }
  0x45   : > { %s300_s22 = scalar_lea.hbm %s854_s3, %s421_s18  ;;  %s302_s5 = sshll.u32 %s240_s4, 4  ;;  %s303_s5 = int_to_ptr.vmem [resolvable:$true] %s302_s5 }
  0x46   : > { %v245_v6 = vsel %vm244_vm0, %v243_v4, 0.0  ;;  %s304_s8 = sshll.u32 %s300_s22, 4  ;;  %s290_s9 = scalar_lea.sflag [#allocation4], %s793_s6  ;;  %s305_s8 = int_to_ptr.hbm [resolvable:$true] %s304_s8 }
  0x47   : > { %v246_v8 = vrot.slane %v245_v6, 4  ;;  %s596_s16 = sshra.s32 %s305_s8, 4  ;;  %s602_s21 = scalar_lea.hbm %s854_s3, 16  ;;  %s597_s16 = int_to_ptr.hbm [resolvable:$true] %s596_s16 }
  0x48   : > { %s598_s28 = scalar_lea.hbm %s597_s16, 8  ;;  %p603_p10 = scmp.lt.s32.totalorder %s597_s16, %s854_s3 }
  0x49   : > { %v247_v10 = vadd.f32 %v246_v8, %v245_v6  ;;  %p599_p1 = scmp.ne.s32.totalorder %s597_s16, %s598_s28  ;;  %p604_p11 = scmp.lt.s32.totalorder %s602_s21, %s598_s28 }
  0x4a   : > { %v489_v1 = vpop.eup %488 }
  0x4b   : > { %v253_v5 = vmul.f32 8.0, %v489_v1  ;;  %v248_v11 = vrot.slane %v247_v10, 2  ;;  %vm257_vm1 = vweird.f32 %v489_v1  ;;  %p600_p4 = pnand %p599_p1, %p747_p7  ;;  %p605_p2 = por %p604_p11, %p603_p10 }
  0x4d   : > { %v254_v7 = vsub.f32 1.0, %v253_v5  ;;  %v249_v13 = vadd.f32 %v248_v11, %v247_v10  ;;  %p601_p8 = pneg %p600_p4 }
  0x4f   : > { %v255_v9 = vmul.f32 %v489_v1, %v254_v7  ;;  %v250_v14 = vrot.slane %v249_v13, 1  ;;  %p606_p12 = pnand %p605_p2, %p601_p8 }
  0x51   : > { %v256_v12 = vadd.f32 %v489_v1, %v255_v9  ;;  %v251_v16 = vadd.f32 %v250_v14, %v249_v13 }
  0x53   : > { %v258_v15 = vsel %vm257_vm1, %v489_v1, %v256_v12 }
  0x54   : > { %v259_v17 = vmul.f32 %v258_v15, %v251_v16 }
  0x56   : > { %v260_v18 = vsub.f32 %v243_v4, %v259_v17 }
  0x58   : > { %v261_v19 = vmul.f32 %v260_v18, %v260_v18 }
  0x5a   : > { %v262_v20 = vsel %vm244_vm0, %v261_v19, 0.0 }
  0x5b   : > { %v263_v21 = vrot.slane %v262_v20, 4 }
  0x5d   : > { %v264_v22 = vadd.f32 %v263_v21, %v262_v20 }
  0x5f   : > { %v265_v23 = vrot.slane %v264_v22, 2 }
  0x61   : > { %v266_v24 = vadd.f32 %v265_v23, %v264_v22 }
  0x63   : > { %v267_v25 = vrot.slane %v266_v24, 1 }
  0x65   : > { %v268_v26 = vadd.f32 %v267_v25, %v266_v24 }
  0x67   : > { %v269_v27 = vmul.f32 %v268_v26, %v258_v15 }
  0x69   : > { %v270_v28 = vadd.f32 1e-05, %v269_v27 }
  0x6b   : > { %490 = vrsqrt.f32 %v270_v28  ;;  %vm277_vm2 = vweird.f32 %v270_v28 }
  0x71   : > { %v491_v29 = vpop.eup %490 }
  0x72   : > { %v272_v30 = vmul.f32 %v491_v29, %v270_v28  ;;  %vm278_vm3 = vweird.f32 %v491_v29 }
  0x73   : > { %vm279_vm4 = vmor %vm277_vm2, %vm278_vm3 }
  0x74   : > { %v273_v31 = vmul.f32 %v491_v29, %v272_v30 }
  0x76   : > { %v274_v32 = vmul.f32 0.5, %v273_v31 }
  0x78   : > { %v275_v33 = vsub.f32 1.5, %v274_v32 }
  0x7a   : > { %v276_v34 = vmul.f32 %v491_v29, %v275_v33 }
  0x7c   : > { %v280_v36 = vsel %vm279_vm4, %v491_v29, %v276_v34 }
  0x7d   : > { %v283_v37 = vmul.f32 %v281_v35, %v280_v36 }
  0x7f   : > { %v284_v38 = vperm.slane %v283_v37, 0 }
  0x81   : > { %v285_v40 = vmul.f32 %v284_v38, %v260_v18 }
  0x83   : > { %v287_v41 = vadd.f32 %v487_v39, %v285_v40 }
  0x85   : > { %288 = vst.msk [vmem:[%s240_s4] sm:$0xff] %vm244_vm0, %v287_v41 }
  0x86   : > { %609 = shalt.err (!%p606_p12)
}
  0x87   : > { %432 = dma.vmem_to_hbm [thread:$0]  (%p747_p7), %s303_s5, 128, %s305_s8, %s290_s9  }
  0x88 PF: > { %s316_s6 = sand.u32 1, %s644_s12   ;;  %p863_p0 = scmp.ge.s32.totalorder %s656_s15, 2 }
  0x89   : > { %s317_s24 = scalar_lea.sflag [#allocation4], %s316_s6 }
  0x8a   : > { %p446_p9 = pnand %p863_p0, %p715_p6 }
  0x8c   : > { %p447_p13 = pneg %p446_p9 }
  0x8e   : > { %639 = dma.done.wait (%p447_p13), %s317_s24, 128  }
  0x8f   : > { %641 = vsyncadd (%p447_p13), %s317_s24, 4294967168  ;;  %s864_s25 = sld [smem:[#allocation13_spill]]  ;;  %p19_p3 = scmp.ge.s32.totalorder %s733_s26, 4  }
  0x90   : > { %s865_s12 = smov %s648_s13  ;;  %s866_s13 = smov %s652_s14 }
  0x91   : > { %s868_s15 = smov %s733_s26  ;;  %21 = sbr.rel (!%p19_p3) target bundleno = 9 (0x9), region = 94 }
  0x95   : > { %s867_s14 = smov %s864_s25 }
  0x96   :  { %323 = vsyncpa [#allocation3], 1 }
  0x97   :  { %325 = vsyncpa [#allocation3 + $0x1], 1 }
  0x98   :  { %326 = vsyncpa [#allocation6], 1 }
  0x99   :  { %328 = vsyncpa [#allocation6 + $0x1], 1 }
  0x9a   :  { %329 = vsyncpa [#allocation4], 1 }
  0x9b   :  { %331 = vsyncpa [#allocation4 + $0x1], 1 }

</bundles_post_ra>
